<compile_context>
chip_gen: v6e
topology: v6e:2x2x1
jax: 0.10.0
libtpu: 0.0.40
codegen_flags: <defaults>
</compile_context>

<pallas_src>
import functools
import math

import jax
import jax.numpy as jnp
from jax import lax
from jax.experimental import pallas as pl
from jax.experimental.pallas import tpu as pltpu


# ---------------------------------------------------------------------------
# Kernel
# ---------------------------------------------------------------------------
def _pe_add_dropout_kernel(seed_ref, x_ref, pe_ref, o_ref, *,
                           dropout_p: float, seq_len: int, hidden: int):
    # x_ref / o_ref block: (1, TS, H);  pe_ref block: (TS, H)
    _, TS, H = x_ref.shape

    y = x_ref[...] + pe_ref[...][None, :, :]

    if dropout_p > 0.0:
        s = pl.program_id(0)                 # sequence-tile index
        b = pl.program_id(1)                 # batch index
        # Stateless hash of the global flat element index + seed.
        row = lax.broadcasted_iota(jnp.int32, (1, TS, H), 1)
        col = lax.broadcasted_iota(jnp.int32, (1, TS, H), 2)
        flat = (b * seq_len + s * TS + row) * hidden + col
        u = flat.astype(jnp.uint32)
        u = (u ^ seed_ref[0].astype(jnp.uint32)) * jnp.uint32(0x9E3779B1)
        # murmur3 fmix32 finalizer
        u = u ^ (u >> 16)
        u = u * jnp.uint32(0x85EBCA6B)
        u = u ^ (u >> 13)
        u = u * jnp.uint32(0xC2B2AE35)
        u = u ^ (u >> 16)
        thresh = jnp.uint32(min(int(dropout_p * 4294967296.0), 4294967295))
        keep = u >= thresh                   # P(keep) ~= 1 - p
        scale = jnp.asarray(1.0 / (1.0 - dropout_p), dtype=y.dtype)
        y = jnp.where(keep, y * scale, jnp.zeros_like(y))

    o_ref[...] = y.astype(o_ref.dtype)


# ---------------------------------------------------------------------------
# Wrapper
# ---------------------------------------------------------------------------
def _pe_table(seq_len: int, num_hiddens: int, dtype) -> jax.Array:
    """Sin/cos PE table for positions [0, seq_len) -- identical math to the
    PyTorch module's precomputed self.PE[:, :seq_len, :]."""
    pos = jnp.arange(seq_len, dtype=jnp.float32)[:, None]
    div = jnp.power(10000.0,
                    jnp.arange(0, num_hiddens, 2, dtype=jnp.float32) / num_hiddens)
    ang = pos / div                                       # (S, ceil(H/2))
    pe = jnp.zeros((seq_len, num_hiddens), jnp.float32)
    pe = pe.at[:, 0::2].set(jnp.sin(ang))
    pe = pe.at[:, 1::2].set(jnp.cos(ang[:, : num_hiddens // 2]))
    return pe.astype(dtype)


def positional_encoding(x: jax.Array, seed: int, dropout_p: float = 0.0,
                        max_len: int = 1000, seq_tile: int | None = None) -> jax.Array:
    """Equivalent of PositionalEncoding(num_hiddens, dropout, max_len)(x)
    in training mode (dropout applied with keep-prob 1-p, scaled by 1/(1-p))."""
    B, S, H = x.shape
    assert S <= max_len, "seq must not exceed max_len"
    assert 0.0 <= dropout_p < 1.0, "dropout_p must be in [0, 1)"

    # PE is batch-invariant: build it once here, pass it in as a resident input.
    pe = _pe_table(S, H, x.dtype)

    # Tile the sequence axis: ~256K elements (~1 MiB f32) per block, rows a
    # multiple of 8 -> 6 double-buffered blocks stay well under the scoped
    # VMEM default on v5e/v6e/v7x.
    if seq_tile is None:
        target_elems = 1 << 18                       # 262144 elements / block
        seq_tile = max(8, (target_elems // max(H, 1)) // 8 * 8)
    seq_tile = min(seq_tile, S)
    grid_s = pl.cdiv(S, seq_tile)

    seed_arr = jnp.asarray([seed], dtype=jnp.int32)
    kernel = functools.partial(_pe_add_dropout_kernel,
                               dropout_p=float(dropout_p),
                               seq_len=S, hidden=H)

    return pl.pallas_call(
        kernel,
        out_shape=jax.ShapeDtypeStruct((B, S, H), x.dtype),
        grid_spec=pltpu.PrefetchScalarGridSpec(
            num_scalar_prefetch=1,
            # seq-tiles outer, batch inner: the PE block index is constant
            # across the inner loop, so PE is DMA'd only grid_s times total.
            grid=(grid_s, B),
            in_specs=[
                pl.BlockSpec((1, seq_tile, H), lambda s, b, seed: (b, s, 0)),
                pl.BlockSpec((seq_tile, H),   lambda s, b, seed: (s, 0)),
            ],
            out_specs=pl.BlockSpec((1, seq_tile, H), lambda s, b, seed: (b, s, 0)),
        ),
        compiler_params=pltpu.CompilerParams(
            # Stateless dropout mask -> every grid step is independent;
            # both axes parallel lets v7x shard across its two TensorCores.
            dimension_semantics=("parallel", "parallel")),
    )(seed_arr, x, pe)


# ---------------------------------------------------------------------------
# Pure-JAX reference (dropout disabled) + self-test
# ---------------------------------------------------------------------------
def _reference_no_dropout(x: jax.Array) -> jax.Array:
    B, S, H = x.shape
    pe = _pe_table(S, H, jnp.float32)
    return (x.astype(jnp.float32) + pe[None, :, :]).astype(x.dtype)


if __name__ == "__main__":
    key = jax.random.PRNGKey(0)
    B, S, H = 2, 8, 32                      # batch, seq, num_hiddens
    x = jax.random.normal(key, (B, S, H), dtype=jnp.float32)

    # 1) dropout = 0.0 -> deterministic, check against pure-JAX reference.
    y0 = jax.block_until_ready(positional_encoding(x, seed=0, dropout_p=0.0))
    ref = _reference_no_dropout(x)
    assert y0.shape == (B, S, H)
    assert jnp.allclose(y0, ref, atol=1e-5, rtol=1e-5), "PE mismatch"

    # 2) dropout = 0.1 (training semantics): surviving elements equal the
    #    no-dropout result scaled by 1/(1-p); dropped elements are zero.
    y1 = jax.block_until_ready(positional_encoding(x, seed=1234, dropout_p=0.1))
    assert y1.shape == (B, S, H)
    kept = y1 != 0
    assert bool(jnp.all(jnp.where(kept,
                                  jnp.abs(y1 - ref / (1.0 - 0.1)) < 1e-4,
                                  True))), "dropout scaling mismatch"

    print("KERNEL_OK")
</pallas_src>

<mosaic_0001>
module attributes {stable_mosaic.version = 11 : i64} {
  func.func @_pe_add_dropout_kernel(%arg0: i32, %arg1: i32, %arg2: memref<1xi32, #tpu.memory_space<smem>>, %arg3: memref<1x8x32xf32, #tpu.memory_space<vmem>>, %arg4: memref<8x32xf32, #tpu.memory_space<vmem>>, %arg5: memref<1x8x32xf32, #tpu.memory_space<vmem>>) attributes {dimension_semantics = [#tpu.dimension_semantics<parallel>, #tpu.dimension_semantics<parallel>], iteration_bounds = array<i64: 1, 2>, scalar_prefetch = 1 : i64, scratch_operands = 0 : i64, tpu.core_type = #tpu.core_type<tc>, window_params = [{transform_indices = @transform_0, window_bounds = array<i64: 1, 8, 32>}, {transform_indices = @transform_1, window_bounds = array<i64: 8, 32>}, {transform_indices = @transform_2, window_bounds = array<i64: 1, 8, 32>}]} {
    %c0 = arith.constant 0 : index
    %c0_0 = arith.constant 0 : index
    %c0_1 = arith.constant 0 : index
    %0 = vector.load %arg3[%c0, %c0_0, %c0_1] : memref<1x8x32xf32, #tpu.memory_space<vmem>>, vector<1x8x32xf32>
    %c0_2 = arith.constant 0 : index
    %c0_3 = arith.constant 0 : index
    %1 = vector.load %arg4[%c0_2, %c0_3] : memref<8x32xf32, #tpu.memory_space<vmem>>, vector<8x32xf32>
    %2 = vector.shape_cast %1 : vector<8x32xf32> to vector<1x8x32xf32>
    %3 = arith.addf %0, %2 : vector<1x8x32xf32>
    %c0_4 = arith.constant 0 : index
    %c0_5 = arith.constant 0 : index
    %c0_6 = arith.constant 0 : index
    %4 = vector.load %arg5[%c0_4, %c0_5, %c0_6] : memref<1x8x32xf32, #tpu.memory_space<vmem>>, vector<1x8x32xf32>
    tpu.vector_store %arg5[%c0_4, %c0_5, %c0_6], %3 {strides = array<i32>} : memref<1x8x32xf32, #tpu.memory_space<vmem>>, vector<1x8x32xf32>,
    return
  }
  func.func @transform_0(%arg0: i32, %arg1: i32, %arg2: memref<1xi32, #tpu.memory_space<smem>>) -> (i32, i32, i32) {
    %c0_i32 = arith.constant 0 : i32
    %c0_i32_0 = arith.constant 0 : i32
    return %arg1, %arg0, %c0_i32 : i32, i32, i32
  }
  func.func @transform_1(%arg0: i32, %arg1: i32, %arg2: memref<1xi32, #tpu.memory_space<smem>>) -> (i32, i32) {
    %c0_i32 = arith.constant 0 : i32
    %c0_i32_0 = arith.constant 0 : i32
    return %arg0, %c0_i32 : i32, i32
  }
  func.func @transform_2(%arg0: i32, %arg1: i32, %arg2: memref<1xi32, #tpu.memory_space<smem>>) -> (i32, i32, i32) {
    %c0_i32 = arith.constant 0 : i32
    %c0_i32_0 = arith.constant 0 : i32
    return %arg1, %arg0, %c0_i32 : i32, i32, i32
  }
}

</mosaic_0001>

<bundles_post_ra>
// kernel: tpu_custom_call.1
= control target key start
LH: loop header
LB: loop body
LE: loop exit
PB: predicated region body
PF: predicated region fallthrough
CT: control target
= control target key end

     0   :  { %9 = vsyncpa [#allocation5], 0  ;;  %s722_s0 = inlined_call_operand.<no memory space> [shape: s32[1], index: 0, kind: input, shape index: {}]   ;;  %s723_s1 = inlined_call_operand.hbm [shape: f32[2,8,32], index: 1, kind: input, shape index: {}]   ;;  %s724_s2 = inlined_call_operand.hbm [shape: f32[8,32], index: 2, kind: input, shape index: {}]   ;;  %s725_s3 = inlined_call_operand.hbm [shape: f32[2,8,32], index: 3, kind: output, shape index: {}]  }
   0x1   :  { %11 = vsyncpa [#allocation5 + $0x1], 0 }
   0x2   :  { %12 = vsyncpa [#allocation8], 0 }
   0x3   :  { %13 = vsyncpa [#allocation6], 0 }
   0x4   :  { %15 = vsyncpa [#allocation6 + $0x1], 0  ;;  %s561_s12 = smov 0   ;;  %s563_s13 = smov 0  }
   0x5   :  { %s565_s14 = smov 0   ;;  %s567_s0 = smov 0  }
   0x6   :  { %s569_s15 = smov 0   ;;  %s571_s16 = smov 0  }
   0x7 LB: > { %s310_s17 = sadd.s32 4294967295, %s536_s16   ;;  %s311_s18 = sadd.s32 4294967294, %s536_s16   ;;  %s536_s16 = sphi %s571_s16, %s21_s16   ;;  %s532_s15 = sphi %s569_s15, %s742_s15   ;;  %s528_s0 = sphi %s567_s0, %s741_s0   ;;  %s524_s14 = sphi %s565_s14, %s740_s14   ;;  %s520_s13 = sphi %s563_s13, %s739_s13   ;;  %s516_s12 = sphi %s561_s12, %s738_s12  }
   0x8   : > { %p55_p0 = scmp.ne.s32.totalorder %s520_s13, %s516_s12  ;;  %p595_p1 = scmp.eq.s32.totalorder %s310_s17, 0 }
   0x9   : > { %p599_p2 = scmp.eq.s32.totalorder %s310_s17, 1  ;;  %p113_p3 = scmp.eq.s32.totalorder %s311_s18, 1 }
   0xa   : > { %p605_p4 = por %p595_p1, %p55_p0  ;;  %p312_p5 = scmp.ge.s32.totalorder %s536_s16, 1 }
   0xb   : > { %p610_p6 = por %p113_p3, %p55_p0  ;;  %p120_p7 = scmp.lt.s32.totalorder %s536_s16, 3 }
   0xc   : > { %s729_s21 = scalar_select %p605_p4, 1, 0 }
   0xd   : > { %s730_s22 = scalar_select %p610_p6, 1, 0 }
   0xe   : > { %p615_p8 = pnand %p312_p5, %p120_p7  ;;  %s538_s24 = smov [#allocation7]  }
   0xf   : > { %s135_s25 = sshll.u32 %s538_s24, 4  ;;  %s30_s27 = sadd.s32 1, %s532_s15  ;;  %s136_s25 = int_to_ptr.vmem [resolvable:$true] %s135_s25 }
  0x10   : > { %p333_p10 = pneg %p615_p8  ;;  %s42_s28 = sadd.s32 1, %s524_s14 }
  0x11   : > { %p31_p12 = scmp.ge.s32.totalorder %s30_s27, 2  ;;  %s409_s29 = scalar_lea.vmem %s136_s25, 128 }
  0x12   : > { %p624_p11 = pnand %p333_p10, %p595_p1  ;;  %p410_p0 = scmp.ne.s32.totalorder %s136_s25, %s409_s29 }
  0x13   : > { %p417_p7 = scmp.lt.s32.totalorder %s136_s25, %s136_s25  ;;  %p418_p6 = scmp.lt.s32.totalorder %s409_s29, %s409_s29 }
  0x14   : > { %p400_p13 = pneg %p624_p11 }
  0x15   : > { %p419_p9 = por %p418_p6, %p417_p7 }
  0x16   : > { %p412_p3 = pnand %p410_p0, %p400_p13 }
  0x18   : > { %p413_p5 = pneg %p412_p3 }
  0x1a   : > { %p420_p4 = pnand %p419_p9, %p413_p5 }
  0x1c   : > { %423 = shalt.err (!%p420_p4)
}
  0x1d   : > { %336 = dma.hbm_to_vmem [thread:$0]  (!%p624_p11), %s724_s2, 128, %s136_s25, [#allocation8]  }
  0x1e   : > { %s744_s27 = smov (%p31_p12, %s30_s27), 0  ;;  %p49_p6 = scmp.ne.s32.totalorder %s524_s14, %s520_s13 }
  0x1f   : > { %p50_p4 = scmp.eq.s32.totalorder %s536_s16, 0  ;;  %s37_s5 = ssub.s32 %s532_s15, %s744_s27 }
  0x20   : > { %p346_p9 = scmp.lt.s32.totalorder %s536_s16, 2  ;;  %p40_p10 = scmp.eq.s32.totalorder %s37_s5, 0 }
  0x21   : > { %p51_p13 = por %p50_p4, %p49_p6  ;;  %p647_p0 = por %p599_p2, %p49_p6 }
  0x22   : > { %s146_s7 = sand.u32 1, %s524_s14   ;;  %s316_s10 = sshll.u32 %s532_s15, 7 }
  0x23   : > { %s653_s8 = scalar_select %p40_p10, %s524_s14, %s42_s28  }
  0x24   : > { %s315_s9 = sshll.u32 %s146_s7, 3  ;;  %s156_s18 = scalar_lea.hbm %s723_s1, %s316_s10 }
  0x25   : > { %s150_s24 = scalar_lea.vmem [#allocation4], %s315_s9  ;;  %p659_p11 = pnand %p346_p9, %p51_p13 }
  0x26   : > { %s158_s25 = sshll.u32 %s150_s24, 4  ;;  %s147_s20 = scalar_lea.sflag [#allocation5], %s146_s7  ;;  %s159_s25 = int_to_ptr.vmem [resolvable:$true] %s158_s25 }
  0x27   : > { %p426_p2 = pneg %p659_p11  ;;  %s437_s29 = scalar_lea.vmem %s159_s25, 128 }
  0x28   : > { %p438_p12 = scmp.ne.s32.totalorder %s159_s25, %s437_s29  ;;  %s539_s28 = smov [#allocation4]  }
  0x29   : > { %s442_s30 = sshll.u32 %s539_s28, 4  ;;  %s443_s30 = int_to_ptr.vmem [resolvable:$false] %s442_s30 }
  0x2a   : > { %p440_p3 = pnand %p438_p12, %p426_p2  ;;  %s444_s4 = scalar_lea.vmem %s443_s30, 256 }
  0x2b   : > { %p445_p7 = scmp.lt.s32.totalorder %s159_s25, %s443_s30  ;;  %p446_p6 = scmp.lt.s32.totalorder %s444_s4, %s437_s29 }
  0x2c   : > { %p441_p5 = pneg %p440_p3 }
  0x2d   : > { %p447_p4 = por %p446_p6, %p445_p7 }
  0x2f   : > { %p448_p10 = pnand %p447_p4, %p441_p5 }
  0x31   : > { %451 = shalt.err (!%p448_p10)
}
  0x32   : > { %340 = dma.hbm_to_vmem [thread:$0]  (!%p659_p11), %s156_s18, 128, %s159_s25, %s147_s20  }
  0x33   : > { %167 = sbr.rel (%p615_p8) target bundleno = 83 (0x53), region = 28  ;;  %s670_s5 = sand.u32 (!%p615_p8), 1, %s520_s13  }
  0x34   : > { %s318_s7 = sshll.u32 (!%p615_p8), %s670_s5, 3  ;;  %s170_s9 = scalar_lea.sflag (!%p615_p8), [#allocation5], %s670_s5 }
  0x35   : > { %s173_s10 = scalar_lea.vmem (!%p615_p8), [#allocation4], %s318_s7  ;;  %p735_p9 = scmp.ne.s32.totalorder (!%p615_p8), %s729_s21, 0 }
  0x38   : > { %503 = dma.done.wait (%p735_p9), %s170_s9, 128  }
  0x39   : > { %505 = vsyncadd (%p735_p9), %s170_s9, 4294967168 }
  0x3a   : > { %507 = dma.done.wait (%p595_p1), [#allocation8], 128  }
  0x3b   : > { %509 = vsyncadd (%p595_p1), [#allocation8], 4294967168  ;;  %s197_s23 = scalar_lea.vmem [#allocation9], %s318_s7  ;;  %s322_s17 = sshll.u32 %s528_s0, 7  ;;  %v198_v0 = vld [vmem:[%s173_s10] sm:$0xff]  ;;  %v199_v1 = vld [vmem:[#allocation7] sm:$0xff] }
  0x3c   : > { %s218_s11 = sshll.u32 %s197_s23, 4  ;;  %vm201_vm0 = vcmask 261120   ;;  %v200_v2 = vadd.f32 %v199_v1, %v198_v0  ;;  %s216_s24 = scalar_lea.hbm %s725_s3, %s322_s17  ;;  %s219_s11 = int_to_ptr.vmem [resolvable:$true] %s218_s11 }
  0x3d   : > { %s204_s25 = scalar_lea.sflag [#allocation6], %s670_s5  ;;  %s452_s26 = scalar_lea.vmem %s219_s11, 128 }
  0x3e   : > { %202 = vst.msk [vmem:[%s197_s23] sm:$0xff] %vm201_vm0, %v200_v2  ;;  %p453_p8 = scmp.ne.s32.totalorder %s219_s11, %s452_s26  ;;  %s540_s19 = smov [#allocation9]  }
  0x3f   : > { %s456_s20 = sshll.u32 %s540_s19, 4  ;;  %s457_s20 = int_to_ptr.vmem [resolvable:$false] %s456_s20 }
  0x40   : > { %p454_p1 = pnand %p453_p8, %p647_p0  ;;  %s458_s0 = scalar_lea.vmem %s457_s20, 256 }
  0x41   : > { %p459_p11 = scmp.lt.s32.totalorder %s219_s11, %s457_s20  ;;  %p460_p2 = scmp.lt.s32.totalorder %s458_s0, %s452_s26 }
  0x42   : > { %p455_p13 = pneg %p454_p1 }
  0x43   : > { %p461_p12 = por %p460_p2, %p459_p11 }
  0x45   : > { %p462_p3 = pnand %p461_p12, %p455_p13 }
  0x47   : > { %465 = shalt.err (!%p462_p3)
}
  0x48   : > { %s466_s29 = scalar_lea.hbm %s216_s24, 128  ;;  %s470_s4 = scalar_lea.hbm %s725_s3, 256 }
  0x49   : > { %p467_p5 = scmp.ne.s32.totalorder %s216_s24, %s466_s29  ;;  %p471_p4 = scmp.lt.s32.totalorder %s216_s24, %s725_s3 }
  0x4a   : > { %p472_p10 = scmp.lt.s32.totalorder %s470_s4, %s466_s29 }
  0x4b   : > { %p468_p7 = pnand %p467_p5, %p647_p0 }
  0x4c   : > { %p473_p9 = por %p472_p10, %p471_p4 }
  0x4d   : > { %p469_p6 = pneg %p468_p7 }
  0x4f   : > { %p474_p8 = pnand %p473_p9, %p469_p6 }
  0x51   : > { %477 = shalt.err (!%p474_p8)
}
  0x52   : > { %331 = dma.vmem_to_hbm [thread:$0]  (%p647_p0), %s219_s11, 128, %s216_s24, %s204_s25  }
  0x53 PF: > { %s230_s9 = sand.u32 1, %s516_s12   ;;  %p736_p1 = scmp.ne.s32.totalorder %s730_s22, 0 }
  0x54   : > { %p737_p13 = scmp.ge.s32.totalorder %s536_s16, 2  ;;  %s231_s10 = scalar_lea.sflag [#allocation6], %s230_s9 }
  0x56   : > { %p342_p11 = pnand %p737_p13, %p736_p1 }
  0x58   : > { %p343_p2 = pneg %p342_p11 }
  0x5a   : > { %511 = dma.done.wait (%p343_p2), %s231_s10, 128  }
  0x5b   : > { %513 = vsyncadd (%p343_p2), %s231_s10, 4294967168  ;;  %s21_s16 = sadd.s32 1, %s536_s16   ;;  %s738_s12 = smov %s520_s13 }
  0x5c   : > { %p18_p12 = scmp.ge.s32.totalorder %s21_s16, 4   ;;  %s739_s13 = smov %s524_s14 }
  0x5d   : > { %s740_s14 = smov %s653_s8  ;;  %s741_s0 = smov %s532_s15 }
  0x5e   : > { %s742_s15 = smov %s744_s27  ;;  %20 = sbr.rel (!%p18_p12) target bundleno = 7 (0x7), region = 78 }
  0x63   :  { %236 = vsyncpa [#allocation5], 1 }
  0x64   :  { %238 = vsyncpa [#allocation5 + $0x1], 1 }
  0x65   :  { %239 = vsyncpa [#allocation8], 1 }
  0x66   :  { %240 = vsyncpa [#allocation6], 1 }
  0x67   :  { %242 = vsyncpa [#allocation6 + $0x1], 1 }

</bundles_post_ra>
